<compile_context>
chip_gen: v5e
topology: v5e:2x2
jax: 0.10.0
libtpu: 0.0.40
codegen_flags: <defaults>
</compile_context>

<pallas_src>
import functools

import jax
import jax.numpy as jnp
from jax.experimental import pallas as pl
from jax.experimental.pallas import tpu as pltpu


def _round_up(x, m):
    return (x + m - 1) // m * m


def _ensemble_kernel(x_ref, w_ref, b_ref, o_ref, acc_ref):
    """Grid = (batch tiles, K tiles).

    x_ref   : [TB, TK]      compute dtype (bf16)
    w_ref   : [TK, C_pad]   compute dtype, pre-summed over models
    b_ref   : [1,  C_pad]   f32, pre-summed over models
    o_ref   : [TB, C_pad]   output dtype
    acc_ref : [TB, C_pad]   f32 accumulator (VMEM scratch, lives across k)
    """
    k = pl.program_id(1)

    @pl.when(k == 0)
    def _():
        acc_ref[...] = jnp.zeros_like(acc_ref)

    acc_ref[...] += jnp.dot(
        x_ref[...], w_ref[...], preferred_element_type=jnp.float32
    )

    @pl.when(k == pl.num_programs(1) - 1)
    def _():
        o_ref[...] = (acc_ref[...] + b_ref[...]).astype(o_ref.dtype)


def pack_ensemble_params(weights, biases, combine_method="sum",
                         compute_dtype=jnp.bfloat16, max_tk=1024):
    """One-time repack: reduce over the model axis, pad, cast.

    weights: [M, D, C_out], biases: [M, 1, C_out].
    Returns (w_packed [D_pad, C_pad] compute_dtype, b_packed [1, C_pad] f32, TK).
    """
    assert combine_method in ("sum", "mean")
    M, D, C_out = weights.shape
    assert M >= 1

    # Exact ensemble algebra: sum_m (x @ W_m + b_m) == x @ sum(W) + sum(b).
    w_sum = jnp.sum(weights.astype(jnp.float32), axis=0)              # [D, C_out]
    b_sum = jnp.sum(biases.astype(jnp.float32), axis=0).reshape(1, C_out)
    if combine_method == "mean":
        w_sum = w_sum / M
        b_sum = b_sum / M

    # Contraction tile: 256-aligned (v6e/v7x MXU is 2x256x256), capped so the
    # double-buffered x / W tiles stay tiny next to the VMEM budget.
    TK = min(_round_up(D, 256), max_tk)
    D_pad = _round_up(D, TK)
    C_pad = _round_up(C_out, 128)   # lane-dense output width (no vst.msk)

    w_packed = jnp.pad(
        w_sum, ((0, D_pad - D), (0, C_pad - C_out))
    ).astype(compute_dtype)
    b_packed = jnp.pad(b_sum, ((0, 0), (0, C_pad - C_out)))            # f32
    return w_packed, b_packed, TK


@functools.partial(jax.jit, static_argnames=("c_out", "tk"))
def ensemble_forward(x_nchw, w_packed, b_packed, *, c_out, tk):
    """x_nchw: [B, C, H, W]; w_packed: [D_pad, C_pad]; b_packed: [1, C_pad]."""
    B = x_nchw.shape[0]
    D = 1
    for s in x_nchw.shape[1:]:
        D *= s
    D_pad, C_pad = w_packed.shape
    TK = tk
    assert D_pad % TK == 0 and D <= D_pad

    compute_dtype = w_packed.dtype
    out_dtype = x_nchw.dtype

    # Batch tiling: pad to a TB multiple (fixes the old dropped-remainder bug).
    if B <= 256:
        TB = _round_up(max(B, 1), 16)      # fill sublanes (bf16 packs 16 rows)
    else:
        TB = 256                           # amortize per-grid-step overhead
    # Give v7x's two TensorCores something to shard when the batch allows it.
    if B > 32 and _round_up(B, TB) // TB < 2:
        TB = _round_up((B + 1) // 2, 16)
    B_pad = _round_up(B, TB)

    x_flat = x_nchw.reshape(B, D)
    x_p = jnp.pad(x_flat, ((0, B_pad - B), (0, D_pad - D))).astype(compute_dtype)

    grid = (B_pad // TB, D_pad // TK)

    # VMEM budget (double-buffered): 2*TB*TK*2 + 2*TK*C_pad*2 + TB*C_pad*4
    # + 2*TB*C_pad*out  ->  ~2 MiB at TB=256, TK=1024, C_pad=128; the explicit
    # 32 MiB limit is valid on every generation (v5e/v6e 128 MiB, v7x 64 MiB).
    out_padded = pl.pallas_call(
        _ensemble_kernel,
        out_shape=jax.ShapeDtypeStruct((B_pad, C_pad), out_dtype),
        grid_spec=pltpu.PrefetchScalarGridSpec(
            num_scalar_prefetch=0,
            grid=grid,
            in_specs=[
                pl.BlockSpec((TB, TK), lambda i, k: (i, k)),
                pl.BlockSpec((TK, C_pad), lambda i, k: (k, 0)),
                pl.BlockSpec((1, C_pad), lambda i, k: (0, 0)),
            ],
            out_specs=pl.BlockSpec((TB, C_pad), lambda i, k: (i, 0)),
            scratch_shapes=[pltpu.VMEM((TB, C_pad), jnp.float32)],
        ),
        compiler_params=pltpu.CompilerParams(
            dimension_semantics=("parallel", "arbitrary"),
            vmem_limit_bytes=32 * 1024 * 1024,
        ),
    )(x_p, w_packed, b_packed)

    return out_padded[:B, :c_out]


if __name__ == "__main__":
    # Small shapes consistent with an image-classification ensemble.
    B, C, H, W = 2, 4, 16, 16
    D = C * H * W
    NUM_CLASSES = 10
    NUM_MODELS = 3
    COMBINE = "mean"  # hparams.model.combine_method in ['sum', 'mean']

    key = jax.random.PRNGKey(0)
    kx, kw, kb = jax.random.split(key, 3)

    x = jax.random.normal(kx, (B, C, H, W), dtype=jnp.float32)
    # Deterministic per-submodel parameters (each submodel = linear classifier).
    # TODO(synk): arbitrary nn.ModuleDict submodels (conv nets etc.) are not
    # representable here; only the linear-classifier case maps to this kernel.
    weights = jax.random.normal(kw, (NUM_MODELS, D, NUM_CLASSES), dtype=jnp.float32) * 0.02
    biases = jax.random.normal(kb, (NUM_MODELS, 1, NUM_CLASSES), dtype=jnp.float32) * 0.1

    # One-time pack (model-load time), then the jitted per-call forward.
    w_packed, b_packed, tk = pack_ensemble_params(weights, biases, COMBINE)
    out = ensemble_forward(x, w_packed, b_packed, c_out=NUM_CLASSES, tk=tk)
    out = jax.block_until_ready(out)

    # Pure-JAX f32 reference of the Ensemble.forward semantics.
    x_flat = x.reshape(B, D)
    ref = jnp.zeros((B, NUM_CLASSES), jnp.float32)
    for m in range(NUM_MODELS):
        ref = ref + (x_flat @ weights[m] + biases[m, 0])
    if COMBINE == "mean":
        ref = ref / NUM_MODELS

    assert out.shape == (B, NUM_CLASSES)
    # Tolerance covers the single bf16 rounding of x and the pre-summed W
    # (f32 accumulation); observed error is O(1e-3) at D=1024.
    assert jnp.allclose(out.astype(jnp.float32), ref, atol=2e-2, rtol=2e-2), \
        "mismatch vs reference"
    print("KERNEL_OK")
</pallas_src>

<mosaic_0001>
module attributes {stable_mosaic.version = 11 : i64} {
  func.func @_ensemble_kernel(%arg0: i32, %arg1: i32, %arg2: memref<16x1024xbf16, #tpu.memory_space<vmem>>, %arg3: memref<1024x128xbf16, #tpu.memory_space<vmem>>, %arg4: memref<1x128xf32, #tpu.memory_space<vmem>>, %arg5: memref<16x128xf32, #tpu.memory_space<vmem>>, %arg6: memref<16x128xf32, #tpu.memory_space<vmem>>) attributes {dimension_semantics = [#tpu.dimension_semantics<parallel>, #tpu.dimension_semantics<arbitrary>], iteration_bounds = array<i64: 1, 1>, scalar_prefetch = 0 : i64, scratch_operands = 1 : i64, tpu.core_type = #tpu.core_type<tc>, window_params = [{transform_indices = @transform_0, window_bounds = array<i64: 16, 1024>}, {transform_indices = @transform_1, window_bounds = array<i64: 1024, 128>}, {pipeline_mode = #tpu.pipeline_mode<synchronous>, transform_indices = @transform_2, window_bounds = array<i64: 1, 128>}, {transform_indices = @transform_3, window_bounds = array<i64: 16, 128>}]} {
    %c0_i32 = arith.constant 0 : i32
    %0 = arith.cmpi eq, %arg1, %c0_i32 : i32
    %1 = arith.extui %0 : i1 to i32
    %c0_i32_0 = arith.constant 0 : i32
    %2 = arith.cmpi ne, %1, %c0_i32_0 : i32
    scf.if %2 {
      %cst_10 = arith.constant 0.000000e+00 : f32
      %12 = vector.broadcast %cst_10 : f32 to vector<16x128xf32>
      %c0_11 = arith.constant 0 : index
      %c0_12 = arith.constant 0 : index
      %13 = vector.load %arg6[%c0_11, %c0_12] : memref<16x128xf32, #tpu.memory_space<vmem>>, vector<16x128xf32>
      tpu.vector_store %arg6[%c0_11, %c0_12], %12 {strides = array<i32>} : memref<16x128xf32, #tpu.memory_space<vmem>>, vector<16x128xf32>,
    } else {
    }
    %c0 = arith.constant 0 : index
    %c0_1 = arith.constant 0 : index
    %3 = vector.load %arg6[%c0, %c0_1] : memref<16x128xf32, #tpu.memory_space<vmem>>, vector<16x128xf32>
    %c0_2 = arith.constant 0 : index
    %c0_3 = arith.constant 0 : index
    %4 = vector.load %arg2[%c0_2, %c0_3] : memref<16x1024xbf16, #tpu.memory_space<vmem>>, vector<16x1024xbf16>
    %c0_4 = arith.constant 0 : index
    %c0_5 = arith.constant 0 : index
    %5 = vector.load %arg3[%c0_4, %c0_5] : memref<1024x128xbf16, #tpu.memory_space<vmem>>, vector<1024x128xbf16>
    %cst = arith.constant dense<0.000000e+00> : vector<16x128xf32>
    %6 = tpu.matmul %4, %5, %cst {dimension_numbers = #tpu.dot_dimension_numbers<[1], [0], [0], [1], [0, 0, 1, 1], [], []>} : vector<16x1024xbf16>, vector<1024x128xbf16>, vector<16x128xf32> -> vector<16x128xf32>
    %7 = arith.addf %3, %6 : vector<16x128xf32>
    %c0_6 = arith.constant 0 : index
    %c0_7 = arith.constant 0 : index
    %8 = vector.load %arg6[%c0_6, %c0_7] : memref<16x128xf32, #tpu.memory_space<vmem>>, vector<16x128xf32>
    tpu.vector_store %arg6[%c0_6, %c0_7], %7 {strides = array<i32>} : memref<16x128xf32, #tpu.memory_space<vmem>>, vector<16x128xf32>,
    %c0_i32_8 = arith.constant 0 : i32
    %9 = arith.cmpi eq, %arg1, %c0_i32_8 : i32
    %10 = arith.extui %9 : i1 to i32
    %c0_i32_9 = arith.constant 0 : i32
    %11 = arith.cmpi ne, %10, %c0_i32_9 : i32
    scf.if %11 {
      %c0_10 = arith.constant 0 : index
      %c0_11 = arith.constant 0 : index
      %12 = vector.load %arg6[%c0_10, %c0_11] : memref<16x128xf32, #tpu.memory_space<vmem>>, vector<16x128xf32>
      %c0_12 = arith.constant 0 : index
      %c0_13 = arith.constant 0 : index
      %13 = vector.load %arg4[%c0_12, %c0_13] : memref<1x128xf32, #tpu.memory_space<vmem>>, vector<1x128xf32>
      %14 = vector.broadcast %13 : vector<1x128xf32> to vector<16x128xf32>
      %15 = arith.addf %12, %14 : vector<16x128xf32>
      %c0_14 = arith.constant 0 : index
      %c0_15 = arith.constant 0 : index
      %16 = vector.load %arg5[%c0_14, %c0_15] : memref<16x128xf32, #tpu.memory_space<vmem>>, vector<16x128xf32>
      tpu.vector_store %arg5[%c0_14, %c0_15], %15 {strides = array<i32>} : memref<16x128xf32, #tpu.memory_space<vmem>>, vector<16x128xf32>,
    } else {
    }
    return
  }
  func.func @transform_0(%arg0: i32, %arg1: i32) -> (i32, i32) {
    %c0_i32 = arith.constant 0 : i32
    return %arg0, %arg1 : i32, i32
  }
  func.func @transform_1(%arg0: i32, %arg1: i32) -> (i32, i32) {
    %c0_i32 = arith.constant 0 : i32
    %c0_i32_0 = arith.constant 0 : i32
    return %arg1, %c0_i32 : i32, i32
  }
  func.func @transform_2(%arg0: i32, %arg1: i32) -> (i32, i32) {
    %c0_i32 = arith.constant 0 : i32
    %c0_i32_0 = arith.constant 0 : i32
    %c0_i32_1 = arith.constant 0 : i32
    return %c0_i32, %c0_i32_0 : i32, i32
  }
  func.func @transform_3(%arg0: i32, %arg1: i32) -> (i32, i32) {
    %c0_i32 = arith.constant 0 : i32
    %c0_i32_0 = arith.constant 0 : i32
    return %arg0, %c0_i32 : i32, i32
  }
}

</mosaic_0001>

<bundles_post_ra>
// kernel: ensemble_forward.1
= control target key start
LH: loop header
LB: loop body
LE: loop exit
PB: predicated region body
PF: predicated region fallthrough
CT: control target
= control target key end

     0   :  { %8 = vsyncpa [#allocation4], 0  ;;  %s1122_s15 = smov [#allocation3]   ;;  %s1123_s17 = smov 64   ;;  %s1205_s0 = inlined_call_operand.vmem [shape: bf16[16,1024], index: 0, kind: input, shape index: {}]   ;;  %s1206_s1 = inlined_call_operand.hbm [shape: bf16[1024,128], index: 1, kind: input, shape index: {}]   ;;  %s1207_s2 = inlined_call_operand.vmem [shape: f32[1,128], index: 2, kind: input, shape index: {}]   ;;  %s1208_s3 = inlined_call_operand.vmem [shape: f32[16,128], index: 3, kind: output, shape index: {}]  }
   0x1   :  { %s15_s14 = sshll.u32 %s1206_s1, 4  ;;  %s17_s16 = sshll.u32 %s1122_s15, 4  ;;  %s16_s14 = int_to_ptr.hbm [resolvable:$true] %s15_s14  ;;  %s18_s16 = int_to_ptr.vmem [resolvable:$true] %s17_s16 }
   0x2   :  { %s1124_s18 = smov 4  }
   0x3   :  { %23 = dma.hbm_to_vmem [thread:$0]  %s16_s14, 8192, %s18_s16, [#allocation4], %s1123_s17, %s1123_s17, %s1124_s18  }
   0x4   :  { %1120 = dma.done.wait [#allocation4], 8192  }
   0x5   :  { %1121 = vsyncadd [#allocation4], 4294959104  ;;  %v1035_v0 = vld [vmem:[#allocation3 + $0x38] sm:$0xff]  ;;  %v1034_v4 = vld [vmem:[#allocation3 + $0x30] sm:$0xff] }
   0x6   :  { %v1043_v1 = vld [vmem:[#allocation3 + $0x78] sm:$0xff]  ;;  %598 = vmatpush.bf16.msra.mxu0 %v1035_v0  ;;  %v1042_v5 = vld [vmem:[#allocation3 + $0x70] sm:$0xff]  ;;  %v1033_v8 = vld [vmem:[#allocation3 + $0x28] sm:$0xff] }
   0x7   :  { %v1051_v2 = vld [vmem:[#allocation3 + $0xb8] sm:$0xff]  ;;  %612 = vmatpush.bf16.msra.mxu1 %v1043_v1  ;;  %v1050_v6 = vld [vmem:[#allocation3 + $0xb0] sm:$0xff]  ;;  %v1041_v9 = vld [vmem:[#allocation3 + $0x68] sm:$0xff] }
   0x8   :  { %v1059_v3 = vld [vmem:[#allocation3 + $0xf8] sm:$0xff]  ;;  %626 = vmatpush.bf16.msra.mxu2 %v1051_v2  ;;  %v1058_v7 = vld [vmem:[#allocation3 + $0xf0] sm:$0xff]  ;;  %v1049_v10 = vld [vmem:[#allocation3 + $0xa8] sm:$0xff] }
   0x9   :  { %640 = vmatpush.bf16.msra.mxu3 %v1059_v3  ;;  %v1057_v11 = vld [vmem:[#allocation3 + $0xe8] sm:$0xff]  ;;  %v1032_v12 = vld [vmem:[#allocation3 + $0x20] sm:$0xff]  ;;  %v1031_v16 = vld [vmem:[#allocation3 + $0x18] sm:$0xff] }
   0xa   :  { %599 = vmatpush.bf16.msra.mxu0 %v1034_v4  ;;  %v1040_v13 = vld [vmem:[#allocation3 + $0x60] sm:$0xff]  ;;  %v1039_v17 = vld [vmem:[#allocation3 + $0x58] sm:$0xff]  ;;  %v1030_v20 = vld [vmem:[#allocation3 + $0x10] sm:$0xff] }
   0xb   :  { %613 = vmatpush.bf16.msra.mxu1 %v1042_v5  ;;  %v1048_v14 = vld [vmem:[#allocation3 + $0xa0] sm:$0xff]  ;;  %v1047_v18 = vld [vmem:[#allocation3 + $0x98] sm:$0xff]  ;;  %v1038_v21 = vld [vmem:[#allocation3 + $0x50] sm:$0xff] }
   0xc   :  { %627 = vmatpush.bf16.msra.mxu2 %v1050_v6  ;;  %v1056_v15 = vld [vmem:[#allocation3 + $0xe0] sm:$0xff]  ;;  %v1055_v19 = vld [vmem:[#allocation3 + $0xd8] sm:$0xff]  ;;  %v1046_v22 = vld [vmem:[#allocation3 + $0x90] sm:$0xff] }
   0xd   :  { %641 = vmatpush.bf16.msra.mxu3 %v1058_v7  ;;  %v1054_v23 = vld [vmem:[#allocation3 + $0xd0] sm:$0xff]  ;;  %v1029_v24 = vld [vmem:[#allocation3 + $0x8] sm:$0xff]  ;;  %v1028_v28 = vld [vmem:[#allocation3] sm:$0xff] }
   0xe   :  { %600 = vmatpush.bf16.msra.mxu0 %v1033_v8  ;;  %v1037_v25 = vld [vmem:[#allocation3 + $0x48] sm:$0xff]  ;;  %v1036_v29 = vld [vmem:[#allocation3 + $0x40] sm:$0xff]  ;;  %v1067_v32 = vld [vmem:[#allocation3 + $0x138] sm:$0xff] }
   0xf   :  { %614 = vmatpush.bf16.msra.mxu1 %v1041_v9  ;;  %v1045_v26 = vld [vmem:[#allocation3 + $0x88] sm:$0xff]  ;;  %v1044_v30 = vld [vmem:[#allocation3 + $0x80] sm:$0xff]  ;;  %v1075_v33 = vld [vmem:[#allocation3 + $0x178] sm:$0xff] }
  0x10   :  { %628 = vmatpush.bf16.msra.mxu2 %v1049_v10  ;;  %v1053_v27 = vld [vmem:[#allocation3 + $0xc8] sm:$0xff]  ;;  %v1052_v31 = vld [vmem:[#allocation3 + $0xc0] sm:$0xff]  ;;  %v1083_v42 = vld [vmem:[#allocation3 + $0x1b8] sm:$0xff] }
  0x11   :  { %642 = vmatpush.bf16.msra.mxu3 %v1057_v11  ;;  %v742_v34 = vld [vmem:[%s1205_s0 + $0x8] sm:$0xf]  ;;  %v1021_v36 = vld [vmem:[%s1205_s0 + $0xc] sm:$0xf]  ;;  %v734_v38 = vld [vmem:[%s1205_s0] sm:$0xf] }
  0x12   :  { %601 = vmatpush.bf16.msra.mxu0 %v1032_v12  ;;  %v1025_v35 = vld [vmem:[%s1205_s0 + $0x24] sm:$0xf0]  ;;  %v744_v37 = vld [vmem:[%s1205_s0 + $0x28] sm:$0xf0]  ;;  %v1024_v39 = vld [vmem:[%s1205_s0 + $0x1c] sm:$0xf0] }
  0x13   :  { %615 = vmatpush.bf16.msra.mxu1 %v1040_v13  ;;  %v1020_v40 = vld [vmem:[%s1205_s0 + $0x4] sm:$0xf]  ;;  %v1091_v43 = vld [vmem:[#allocation3 + $0x1f8] sm:$0xff]  ;;  %v743_v44 = vor.u32 %v1025_v35, %v742_v34  ;;  %v747_v45 = vor.u32 %v1021_v36, %v744_v37  ;;  %v735_v46 = vor.u32 %v1024_v39, %v734_v38  ;;  %v1066_v48 = vld [vmem:[#allocation3 + $0x130] sm:$0xff] }
  0x14   :  { %629 = vmatpush.bf16.msra.mxu2 %v1048_v14  ;;  %v736_v41 = vld [vmem:[%s1205_s0 + $0x20] sm:$0xf0]  ;;  %v1074_v49 = vld [vmem:[#allocation3 + $0x170] sm:$0xff]  ;;  %v1065_v52 = vld [vmem:[#allocation3 + $0x128] sm:$0xff] }
  0x15   :  { %643 = vmatpush.bf16.msra.mxu3 %v1056_v15  ;;  %v739_v47 = vor.u32 %v1020_v40, %v736_v41  ;;  %v1082_v50 = vld [vmem:[#allocation3 + $0x1b0] sm:$0xff]  ;;  %v1073_v53 = vld [vmem:[#allocation3 + $0x168] sm:$0xff]  ;;  %v1064_v56 = vld [vmem:[#allocation3 + $0x120] sm:$0xff] }
  0x16   :  { %602 = vmatpush.bf16.msra.mxu0 %v1031_v16  ;;  %v1090_v51 = vld [vmem:[#allocation3 + $0x1f0] sm:$0xff]  ;;  %v1081_v54 = vld [vmem:[#allocation3 + $0x1a8] sm:$0xff]  ;;  %v1072_v57 = vld [vmem:[#allocation3 + $0x160] sm:$0xff] }
  0x17   :  { %616 = vmatpush.bf16.msra.mxu1 %v1039_v17  ;;  %v1089_v55 = vld [vmem:[#allocation3 + $0x1e8] sm:$0xff]  ;;  %v1080_v58 = vld [vmem:[#allocation3 + $0x1a0] sm:$0xff]  ;;  %v1063_v60 = vld [vmem:[#allocation3 + $0x118] sm:$0xff] }
  0x18   :  { %630 = vmatpush.bf16.msra.mxu2 %v1047_v18  ;;  %v1088_v59 = vld [vmem:[#allocation3 + $0x1e0] sm:$0xff]  ;;  %v1071_v61 = vld [vmem:[#allocation3 + $0x158] sm:$0xff]  ;;  %v1062_v0 = vld [vmem:[#allocation3 + $0x110] sm:$0xff] }
  0x19   :  { %644 = vmatpush.bf16.msra.mxu3 %v1055_v19  ;;  %v1079_v62 = vld [vmem:[#allocation3 + $0x198] sm:$0xff]  ;;  %v1070_v1 = vld [vmem:[#allocation3 + $0x150] sm:$0xff]  ;;  %v1061_v4 = vld [vmem:[#allocation3 + $0x108] sm:$0xff] }
  0x1a   :  { %603 = vmatpush.bf16.msra.mxu0 %v1030_v20  ;;  %v1087_v63 = vld [vmem:[#allocation3 + $0x1d8] sm:$0xff]  ;;  %v1078_v2 = vld [vmem:[#allocation3 + $0x190] sm:$0xff]  ;;  %v1069_v5 = vld [vmem:[#allocation3 + $0x148] sm:$0xff] }
  0x1b   :  { %617 = vmatpush.bf16.msra.mxu1 %v1038_v21  ;;  %v1086_v3 = vld [vmem:[#allocation3 + $0x1d0] sm:$0xff]  ;;  %v1077_v6 = vld [vmem:[#allocation3 + $0x188] sm:$0xff]  ;;  %v1060_v8 = vld [vmem:[#allocation3 + $0x100] sm:$0xff] }
  0x1c   :  { %631 = vmatpush.bf16.msra.mxu2 %v1046_v22  ;;  %v1085_v7 = vld [vmem:[#allocation3 + $0x1c8] sm:$0xff]  ;;  %v1068_v9 = vld [vmem:[#allocation3 + $0x140] sm:$0xff]  ;;  %v750_v12 = vld [vmem:[%s1205_s0 + $0x10] sm:$0xf] }
  0x1d   :  { %645 = vmatpush.bf16.msra.mxu3 %v1054_v23  ;;  %v1076_v10 = vld [vmem:[#allocation3 + $0x180] sm:$0xff]  ;;  %v1026_v13 = vld [vmem:[%s1205_s0 + $0x2c] sm:$0xf0]  ;;  %v1022_v14 = vld [vmem:[%s1205_s0 + $0x14] sm:$0xf] }
  0x1e   :  { %604 = vmatpush.bf16.msra.mxu0 %v1029_v24  ;;  %v1084_v11 = vld [vmem:[#allocation3 + $0x1c0] sm:$0xff]  ;;  %v752_v15 = vld [vmem:[%s1205_s0 + $0x30] sm:$0xf0]  ;;  %v758_v16 = vld [vmem:[%s1205_s0 + $0x18] sm:$0xf]  ;;  %v751_v20 = vor.u32 %v1026_v13, %v750_v12 }
  0x1f   :  { %618 = vmatpush.bf16.msra.mxu1 %v1037_v25  ;;  %v1027_v17 = vld [vmem:[%s1205_s0 + $0x34] sm:$0xf0]  ;;  %v1023_v18 = vld [vmem:[%s1205_s0 + $0x1c] sm:$0xf]  ;;  %v755_v21 = vor.u32 %v1022_v14, %v752_v15 }
  0x20   :  { %632 = vmatpush.bf16.msra.mxu2 %v1045_v26  ;;  %v760_v19 = vld [vmem:[%s1205_s0 + $0x38] sm:$0xf0]  ;;  %v759_v22 = vor.u32 %v1027_v17, %v758_v16 }
  0x21   :  { %646 = vmatpush.bf16.msra.mxu3 %v1053_v27  ;;  %v763_v23 = vor.u32 %v1023_v18, %v760_v19 }
  0x22   :  { %605 = vmatpush.bf16.msra.mxu0 %v1028_v28 }
  0x23   :  { %619 = vmatpush.bf16.msra.mxu1 %v1036_v29 }
  0x24   :  { %633 = vmatpush.bf16.msra.mxu2 %v1044_v30 }
  0x25   :  { %647 = vmatpush.bf16.msra.mxu3 %v1052_v31  ;;  %606 = vmatmul.bf16.vlgmr.msra.gmra.mxu0 %v735_v46 }
  0x26   :  { %654 = vmatpush.bf16.msrb.mxu0 %v1067_v32  ;;  %620 = vmatmul.bf16.vlgmr.msra.gmra.mxu1 %v739_v47 }
  0x27   :  { %668 = vmatpush.bf16.msrb.mxu1 %v1075_v33  ;;  %634 = vmatmul.bf16.vlgmr.msra.gmra.mxu2 %v743_v44 }
  0x28   :  { %682 = vmatpush.bf16.msrb.mxu2 %v1083_v42  ;;  %648 = vmatmul.bf16.vlgmr.msra.gmra.mxu3 %v747_v45  ;;  %v1095_v45 = vld [vmem:[%s1207_s2] ss:$0 sm:$0xff] }
  0x29   :  { %696 = vmatpush.bf16.msrb.mxu3 %v1091_v43 }
  0x2a   :  { %655 = vmatpush.bf16.msrb.mxu0 %v1066_v48 }
  0x2b   :  { %669 = vmatpush.bf16.msrb.mxu1 %v1074_v49 }
  0x2c   :  { %683 = vmatpush.bf16.msrb.mxu2 %v1082_v50 }
  0x2d   :  { %697 = vmatpush.bf16.msrb.mxu3 %v1090_v51 }
  0x2e   :  { %656 = vmatpush.bf16.msrb.mxu0 %v1065_v52 }
  0x2f   :  { %670 = vmatpush.bf16.msrb.mxu1 %v1073_v53 }
  0x30   :  { %684 = vmatpush.bf16.msrb.mxu2 %v1081_v54 }
  0x31   :  { %698 = vmatpush.bf16.msrb.mxu3 %v1089_v55 }
  0x32   :  { %657 = vmatpush.bf16.msrb.mxu0 %v1064_v56 }
  0x33   :  { %671 = vmatpush.bf16.msrb.mxu1 %v1072_v57 }
  0x34   :  { %685 = vmatpush.bf16.msrb.mxu2 %v1080_v58 }
  0x35   :  { %699 = vmatpush.bf16.msrb.mxu3 %v1088_v59 }
  0x36   :  { %658 = vmatpush.bf16.msrb.mxu0 %v1063_v60 }
  0x37   :  { %672 = vmatpush.bf16.msrb.mxu1 %v1071_v61 }
  0x38   :  { %686 = vmatpush.bf16.msrb.mxu2 %v1079_v62 }
  0x39   :  { %700 = vmatpush.bf16.msrb.mxu3 %v1087_v63 }
  0x3a   :  { %659 = vmatpush.bf16.msrb.mxu0 %v1062_v0 }
  0x3b   :  { %673 = vmatpush.bf16.msrb.mxu1 %v1070_v1 }
  0x3c   :  { %687 = vmatpush.bf16.msrb.mxu2 %v1078_v2 }
  0x3d   :  { %701 = vmatpush.bf16.msrb.mxu3 %v1086_v3 }
  0x3e   :  { %660 = vmatpush.bf16.msrb.mxu0 %v1061_v4 }
  0x3f   :  { %674 = vmatpush.bf16.msrb.mxu1 %v1069_v5 }
  0x40   :  { %688 = vmatpush.bf16.msrb.mxu2 %v1077_v6 }
  0x41   :  { %702 = vmatpush.bf16.msrb.mxu3 %v1085_v7 }
  0x42   :  { %661 = vmatpush.bf16.msrb.mxu0 %v1060_v8 }
  0x43   :  { %675 = vmatpush.bf16.msrb.mxu1 %v1068_v9 }
  0x44   :  { %689 = vmatpush.bf16.msrb.mxu2 %v1076_v10 }
  0x45   :  { %703 = vmatpush.bf16.msrb.mxu3 %v1084_v11  ;;  %662 = vmatmul.bf16.vlgmr.msrb.gmra.mxu0 %v751_v20 }
  0x46   :  { %676 = vmatmul.bf16.vlgmr.msrb.gmra.mxu1 %v755_v21 }
  0x47   :  { %690 = vmatmul.bf16.vlgmr.msrb.gmra.mxu2 %v759_v22 }
  0x48   :  { %704 = vmatmul.bf16.vlgmr.msrb.gmra.mxu3 %v763_v23 }
  0xa2   :  { %v607_v24 = vpop.f32.mrf.mxu0 }
  0xa3   :  { %v621_v25 = vpop.f32.mrf.mxu1 }
  0xa4   :  { %v622_v28 = vadd.f32 %v621_v25, %v607_v24 }
  0xaa   :  { %v635_v26 = vpop.f32.mrf.mxu2  ;;  %v609_v29 = vpop.f32.mrf.mxu0 }
  0xab   :  { %v649_v27 = vpop.f32.mrf.mxu3  ;;  %v623_v30 = vpop.f32.mrf.mxu1  ;;  %v636_v31 = vadd.f32 %v635_v26, %v622_v28 }
  0xac   :  { %v624_v35 = vadd.f32 %v623_v30, %v609_v29 }
  0xad   :  { %v650_v34 = vadd.f32 %v649_v27, %v636_v31 }
  0xb2   :  { %v637_v32 = vpop.f32.mrf.mxu2 }
  0xb3   :  { %v651_v33 = vpop.f32.mrf.mxu3  ;;  %v638_v39 = vadd.f32 %v637_v32, %v624_v35 }
  0xb5   :  { %v652_v43 = vadd.f32 %v651_v33, %v638_v39 }
  0xc2   :  { %v663_v36 = vpop.f32.mrf.mxu0 }
  0xc3   :  { %v664_v37 = vadd.f32 %v663_v36, %v650_v34  ;;  %v677_v38 = vpop.f32.mrf.mxu1 }
  0xc5   :  { %v678_v40 = vadd.f32 %v677_v38, %v664_v37 }
  0xca   :  { %v691_v41 = vpop.f32.mrf.mxu2  ;;  %v665_v46 = vpop.f32.mrf.mxu0 }
  0xcb   :  { %v705_v42 = vpop.f32.mrf.mxu3  ;;  %v692_v44 = vadd.f32 %v691_v41, %v678_v40  ;;  %v666_v48 = vadd.f32 %v665_v46, %v652_v43  ;;  %v679_v50 = vpop.f32.mrf.mxu1 }
  0xcd   :  { %v706_v47 = vadd.f32 %v705_v42, %v692_v44  ;;  %v680_v51 = vadd.f32 %v679_v50, %v666_v48 }
  0xcf   :  { %v723_v49 = vadd.f32 %v1095_v45, %v706_v47 }
  0xd1   :  { %725 = vst [vmem:[%s1208_s3] sm:$0xff] %v723_v49 }
  0xd2   :  { %v693_v52 = vpop.f32.mrf.mxu2 }
  0xd3   :  { %v694_v53 = vadd.f32 %v693_v52, %v680_v51  ;;  %v707_v54 = vpop.f32.mrf.mxu3 }
  0xd5   :  { %v708_v55 = vadd.f32 %v707_v54, %v694_v53 }
  0xd7   :  { %v724_v56 = vadd.f32 %v1095_v45, %v708_v55 }
  0xd9   :  { %726 = vst [vmem:[%s1208_s3 + $0x8] sm:$0xff] %v724_v56 }
  0xda   :  { %731 = vsyncpa [#allocation4], 1 }

</bundles_post_ra>
